<compile_context>
chip_gen: v7x
topology: tpu7x:2x2x1
jax: 0.10.0
libtpu: 0.0.40
codegen_flags: <defaults>
</compile_context>

<pallas_src>
import functools

import numpy as np
import jax
import jax.numpy as jnp
from jax import lax
from jax.experimental import pallas as pl
from jax.experimental.pallas import tpu as pltpu


def _choose_spatial_tile(hw, cap):
    """Largest lane-aligned spatial tile <= cap; prefer one that divides hw."""
    cap = max(128, (cap // 128) * 128)
    if hw <= cap:
        return hw                      # single tile == full row, always legal
    if hw % 128 == 0:
        nl = hw // 128
        for d in range(cap // 128, 0, -1):
            if nl % d == 0 and d * 128 >= cap // 2:
                return d * 128         # evenly dividing tile, no ragged tail
    return cap                         # ragged tail handled in-kernel


# ----------------------------- Pallas kernel --------------------------------
def aggregation_kernel(sids_ref,                                   # SMEM prefetch
                       mask_ref, quat_ref, scl_ref, z_ref, xy_ref, # inputs
                       xy_out, quat_out, scl_out, z_out,           # outputs
                       acc_q, acc_s, acc_z, msz,                   # scratch
                       *, hw):
    del sids_ref                                  # only used by the index_maps
    sj = pl.program_id(1)                         # spatial (reduction) axis

    @pl.when(sj == 0)
    def _init():
        acc_q[...] = jnp.zeros_like(acc_q)
        acc_s[...] = jnp.zeros_like(acc_s)
        acc_z[...] = jnp.zeros_like(acc_z)
        msz[...] = jnp.zeros_like(msz)

    lt = mask_ref.shape[-1]
    m = mask_ref[0]                               # (1, lt) binary f32
    if hw % lt != 0:                              # static: only when tail is ragged
        col = lax.broadcasted_iota(jnp.int32, (1, lt), 1) + sj * lt
        m = jnp.where(col < hw, m, 0.0)
    mb = m != 0.0                                 # (1, lt) bool

    # where-select (not multiply) so stale OOB bytes can never NaN-poison sums
    xy_out[0] = jnp.where(mb, xy_ref[0], 0.0)                           # (2, lt)
    acc_q[...] += jnp.sum(jnp.where(mb, quat_ref[0], 0.0), axis=-1, keepdims=True)
    acc_s[...] += jnp.sum(jnp.where(mb, scl_ref[0], 0.0), axis=-1, keepdims=True)
    acc_z[...] += jnp.sum(jnp.where(mb, z_ref[0], 0.0), axis=-1, keepdims=True)
    msz[...]   += jnp.sum(m, axis=-1, keepdims=True)

    @pl.when(sj == pl.num_programs(1) - 1)
    def _finalize():
        inv = 1.0 / msz[...]            # (1,1); empty mask -> inf/NaN like torch.div
        qm = acc_q[...] * inv           # (4, 1)
        qnorm = jnp.sqrt(jnp.sum(qm * qm, keepdims=True))
        quat_out[0] = qm / jnp.maximum(qnorm, 1e-12)    # F.normalize(eps) semantics
        scl_out[0] = acc_s[...] * inv
        z_out[0] = jnp.exp(acc_z[...] * inv)


# ------------------------------- wrapper -------------------------------------
def aggregate(instance_masks, sample_ids, class_ids,
              quaternion, scales, z, xy, *, spatial_tile=32768):
    """instance_masks (N,H,W) {0,1}; sample_ids (N,) int; class_ids (N,) int;
    quaternion (B,4,H,W) f32; scales (B,3,H,W); z (B,H,W); xy (B,2,H,W).
    Returns quat (N,4), scales (N,3), z (N,1), masked xy (N,2,H,W), class_ids."""
    n, h, w = instance_masks.shape
    b = quaternion.shape[0]
    hw = h * w
    if n == 0:
        zf = jnp.zeros
        return (zf((0, 4), jnp.float32), zf((0, 3), jnp.float32),
                zf((0, 1), jnp.float32), zf((0, 2, h, w), jnp.float32), class_ids)

    lt = _choose_spatial_tile(hw, spatial_tile)
    grid = (n, pl.cdiv(hw, lt))

    # metadata-only reshapes -- no extra HBM passes before the kernel
    mask3 = instance_masks.reshape(n, 1, hw).astype(jnp.float32)
    quat2 = quaternion.reshape(b, 4, hw)
    scl2 = scales.reshape(b, 3, hw)
    z2 = z.reshape(b, 1, hw)
    xy2 = xy.reshape(b, 2, hw)
    sids = sample_ids.astype(jnp.int32)

    gather = lambda ti, sj, sids: (sids[ti], 0, sj)   # fused sample_id gather
    own = lambda ti, sj, sids: (ti, 0, sj)
    once = lambda ti, sj, sids: (ti, 0, 0)

    xy_o, q_o, s_o, z_o = pl.pallas_call(
        functools.partial(aggregation_kernel, hw=hw),
        out_shape=(jax.ShapeDtypeStruct((n, 2, hw), jnp.float32),
                   jax.ShapeDtypeStruct((n, 4, 1), jnp.float32),
                   jax.ShapeDtypeStruct((n, 3, 1), jnp.float32),
                   jax.ShapeDtypeStruct((n, 1, 1), jnp.float32)),
        grid_spec=pltpu.PrefetchScalarGridSpec(
            num_scalar_prefetch=1,
            grid=grid,
            in_specs=[
                pl.BlockSpec((1, 1, lt), own),      # instance mask
                pl.BlockSpec((1, 4, lt), gather),   # quaternion[sample_id]
                pl.BlockSpec((1, 3, lt), gather),   # scales[sample_id]
                pl.BlockSpec((1, 1, lt), gather),   # z[sample_id]
                pl.BlockSpec((1, 2, lt), gather),   # xy[sample_id]
            ],
            out_specs=(
                pl.BlockSpec((1, 2, lt), own),      # dense masked xy (f32, final layout)
                pl.BlockSpec((1, 4, 1), once),
                pl.BlockSpec((1, 3, 1), once),
                pl.BlockSpec((1, 1, 1), once),
            ),
            scratch_shapes=[pltpu.VMEM((4, 1), jnp.float32),
                            pltpu.VMEM((3, 1), jnp.float32),
                            pltpu.VMEM((1, 1), jnp.float32),
                            pltpu.VMEM((1, 1), jnp.float32)],
        ),
        compiler_params=pltpu.CompilerParams(
            dimension_semantics=("parallel", "arbitrary"),
            vmem_limit_bytes=48 * 1024 * 1024),
    )(sids, mask3, quat2, scl2, z2, xy2)

    return (q_o[:, :, 0], s_o[:, :, 0], z_o[:, :, 0],
            xy_o.reshape(n, 2, h, w), class_ids)


# ------------------------------ host glue ------------------------------------
# TODO(synk): connected-component labeling (scipy.ndimage.label with the
# module's plus-shaped structure = per-slice 4-connectivity) is inherently
# sequential (union-find) and has no clean Pallas equivalent; done on host.
def label_components_4conn(binary):
    bsz, h, w = binary.shape
    labels = np.zeros((bsz, h, w), dtype=np.int64)
    cur = 0
    for bi in range(bsz):
        for i in range(h):
            for j in range(w):
                if binary[bi, i, j] and labels[bi, i, j] == 0:
                    cur += 1
                    stack = [(i, j)]
                    labels[bi, i, j] = cur
                    while stack:
                        y, x = stack.pop()
                        for dy, dx in ((1, 0), (-1, 0), (0, 1), (0, -1)):
                            ny, nx = y + dy, x + dx
                            if (0 <= ny < h and 0 <= nx < w
                                    and binary[bi, ny, nx]
                                    and labels[bi, ny, nx] == 0):
                                labels[bi, ny, nx] = cur
                                stack.append((ny, nx))
    return labels, cur


def build_instances(cat_mask_np):
    labels, _total = label_components_4conn(cat_mask_np != 0)
    bsz = cat_mask_np.shape[0]
    inst_masks, sample_ids, class_ids = [], [], []
    for bi in range(bsz):
        ids = np.unique(labels[bi])
        ids = ids[ids != 0]
        for lab in ids:
            comp = labels[bi] == lab
            inst_masks.append(comp.astype(np.float32))
            sample_ids.append(bi)
            # torch.unique(class_instance_mask)[1] == smallest nonzero class
            class_ids.append(int(cat_mask_np[bi][comp].min()))
    return (np.stack(inst_masks, 0),
            np.asarray(sample_ids, dtype=np.int64),
            np.asarray(class_ids, dtype=np.int64))


# --------------------------------- test ---------------------------------------
def _run_case(cat_mask, key, spatial_tile):
    bsz, h, w = cat_mask.shape
    kq, ks, kxy, kz = jax.random.split(key, 4)
    quaternion = jax.random.normal(kq, (bsz, 4, h, w), dtype=jnp.float32)
    scales = jax.random.normal(ks, (bsz, 3, h, w), dtype=jnp.float32)
    xy = jax.random.normal(kxy, (bsz, 2, h, w), dtype=jnp.float32)
    z = jax.random.normal(kz, (bsz, h, w), dtype=jnp.float32) * 0.1

    inst_masks_np, sample_ids_np, cls_np = build_instances(cat_mask)
    inst_masks = jnp.asarray(inst_masks_np)
    sids = jnp.asarray(sample_ids_np.astype(np.int32))
    cls_ids = jnp.asarray(cls_np.astype(np.int32))

    outs = aggregate(inst_masks, sids, cls_ids, quaternion, scales, z, xy,
                     spatial_tile=spatial_tile)
    quat_agg, scl_agg, z_agg, xy_agg, cls_agg = outs
    for t in outs:
        jax.block_until_ready(t)

    # plain-numpy f32 reference of the module math
    q_np, s_np = np.asarray(quaternion), np.asarray(scales)
    xy_np, z_np = np.asarray(xy), np.asarray(z)
    m, sid = inst_masks_np, sample_ids_np
    msize = m.sum((-2, -1))[:, None]
    mq = (m[:, None] * q_np[sid]).sum((-2, -1)) / msize
    q_ref = mq / np.maximum(np.linalg.norm(mq, axis=1, keepdims=True), 1e-12)
    s_ref = (m[:, None] * s_np[sid]).sum((-2, -1)) / msize
    z_ref = np.exp((m[:, None] * z_np[sid][:, None]).sum((-2, -1)) / msize)
    xy_ref = m[:, None] * xy_np[sid]

    assert np.allclose(np.asarray(quat_agg), q_ref, atol=1e-5, rtol=1e-4), "quat"
    assert np.allclose(np.asarray(scl_agg), s_ref, atol=1e-5, rtol=1e-4), "scales"
    assert np.allclose(np.asarray(z_agg), z_ref, atol=1e-5, rtol=1e-4), "z"
    assert np.allclose(np.asarray(xy_agg), xy_ref, atol=1e-6), "xy"
    assert np.array_equal(np.asarray(cls_agg), cls_np), "class_ids"


if __name__ == "__main__":
    # Case 1: 2x16x16, single spatial tile.
    cm1 = np.zeros((2, 16, 16), dtype=np.int32)
    cm1[0, 2:6, 2:6] = 1
    cm1[0, 9:14, 8:13] = 2
    cm1[1, 1:5, 10:15] = 3
    cm1[1, 8:12, 2:7] = 1
    cm1[1, 11:15, 11:14] = 2

    # Case 2: 2x12x20 (hw=240) with a 128-lane tile -> multi-tile + ragged tail.
    cm2 = np.zeros((2, 12, 20), dtype=np.int32)
    cm2[0, 2:7, 3:9] = 1
    cm2[0, 8:11, 12:18] = 2
    cm2[1, 1:5, 1:6] = 3
    cm2[1, 6:11, 10:19] = 1

    key = jax.random.PRNGKey(0)
    k1, k2 = jax.random.split(key)
    _run_case(cm1, k1, spatial_tile=32768)
    _run_case(cm2, k2, spatial_tile=128)

    print("KERNEL_OK")
</pallas_src>

<mosaic_0001>
module attributes {stable_mosaic.version = 11 : i64} {
  func.func @aggregation_kernel(%arg0: i32, %arg1: i32, %arg2: memref<5xi32, #tpu.memory_space<smem>>, %arg3: memref<1x1x256xf32, #tpu.memory_space<vmem>>, %arg4: memref<1x4x256xf32, #tpu.memory_space<vmem>>, %arg5: memref<1x3x256xf32, #tpu.memory_space<vmem>>, %arg6: memref<1x1x256xf32, #tpu.memory_space<vmem>>, %arg7: memref<1x2x256xf32, #tpu.memory_space<vmem>>, %arg8: memref<1x2x256xf32, #tpu.memory_space<vmem>>, %arg9: memref<1x4x1xf32, #tpu.memory_space<vmem>>, %arg10: memref<1x3x1xf32, #tpu.memory_space<vmem>>, %arg11: memref<1x1x1xf32, #tpu.memory_space<vmem>>, %arg12: memref<4x1xf32, #tpu.memory_space<vmem>>, %arg13: memref<3x1xf32, #tpu.memory_space<vmem>>, %arg14: memref<1x1xf32, #tpu.memory_space<vmem>>, %arg15: memref<1x1xf32, #tpu.memory_space<vmem>>) attributes {dimension_semantics = [#tpu.dimension_semantics<parallel>, #tpu.dimension_semantics<arbitrary>], iteration_bounds = array<i64: 5, 1>, scalar_prefetch = 1 : i64, scratch_operands = 4 : i64, tpu.core_type = #tpu.core_type<tc>, window_params = [{transform_indices = @transform_0, window_bounds = array<i64: 1, 1, 256>}, {transform_indices = @transform_1, window_bounds = array<i64: 1, 4, 256>}, {transform_indices = @transform_2, window_bounds = array<i64: 1, 3, 256>}, {transform_indices = @transform_3, window_bounds = array<i64: 1, 1, 256>}, {transform_indices = @transform_4, window_bounds = array<i64: 1, 2, 256>}, {transform_indices = @transform_5, window_bounds = array<i64: 1, 2, 256>}, {transform_indices = @transform_6, window_bounds = array<i64: 1, 4, 1>}, {transform_indices = @transform_7, window_bounds = array<i64: 1, 3, 1>}, {transform_indices = @transform_8, window_bounds = array<i64: 1, 1, 1>}]} {
    %c0_i32 = arith.constant 0 : i32
    %0 = arith.cmpi eq, %arg1, %c0_i32 : i32
    %1 = arith.extui %0 : i1 to i32
    %c0_i32_0 = arith.constant 0 : i32
    %2 = arith.cmpi ne, %1, %c0_i32_0 : i32
    scf.if %2 {
      %cst_44 = arith.constant 0.000000e+00 : f32
      %55 = vector.broadcast %cst_44 : f32 to vector<4x1xf32>
      %c0_45 = arith.constant 0 : index
      %c0_46 = arith.constant 0 : index
      %56 = vector.load %arg12[%c0_45, %c0_46] : memref<4x1xf32, #tpu.memory_space<vmem>>, vector<4x1xf32>
      tpu.vector_store %arg12[%c0_45, %c0_46], %55 {strides = array<i32>} : memref<4x1xf32, #tpu.memory_space<vmem>>, vector<4x1xf32>,
      %cst_47 = arith.constant 0.000000e+00 : f32
      %57 = vector.broadcast %cst_47 : f32 to vector<3x1xf32>
      %c0_48 = arith.constant 0 : index
      %c0_49 = arith.constant 0 : index
      %58 = vector.load %arg13[%c0_48, %c0_49] : memref<3x1xf32, #tpu.memory_space<vmem>>, vector<3x1xf32>
      tpu.vector_store %arg13[%c0_48, %c0_49], %57 {strides = array<i32>} : memref<3x1xf32, #tpu.memory_space<vmem>>, vector<3x1xf32>,
      %cst_50 = arith.constant 0.000000e+00 : f32
      %59 = vector.broadcast %cst_50 : f32 to vector<1x1xf32>
      %c0_51 = arith.constant 0 : index
      %c0_52 = arith.constant 0 : index
      %60 = vector.load %arg14[%c0_51, %c0_52] : memref<1x1xf32, #tpu.memory_space<vmem>>, vector<1x1xf32>
      tpu.vector_store %arg14[%c0_51, %c0_52], %59 {strides = array<i32>} : memref<1x1xf32, #tpu.memory_space<vmem>>, vector<1x1xf32>,
      %cst_53 = arith.constant 0.000000e+00 : f32
      %61 = vector.broadcast %cst_53 : f32 to vector<1x1xf32>
      %c0_54 = arith.constant 0 : index
      %c0_55 = arith.constant 0 : index
      %62 = vector.load %arg15[%c0_54, %c0_55] : memref<1x1xf32, #tpu.memory_space<vmem>>, vector<1x1xf32>
      tpu.vector_store %arg15[%c0_54, %c0_55], %61 {strides = array<i32>} : memref<1x1xf32, #tpu.memory_space<vmem>>, vector<1x1xf32>,
    } else {
    }
    %c0 = arith.constant 0 : index
    %c0_1 = arith.constant 0 : index
    %c0_2 = arith.constant 0 : index
    %3 = vector.load %arg3[%c0, %c0_1, %c0_2] : memref<1x1x256xf32, #tpu.memory_space<vmem>>, vector<1x1x256xf32>
    %4 = vector.shape_cast %3 : vector<1x1x256xf32> to vector<1x256xf32>
    %cst = arith.constant 0.000000e+00 : f32
    %5 = vector.broadcast %cst : f32 to vector<1x256xf32>
    %6 = arith.cmpf one, %4, %5 : vector<1x256xf32>
    %c0_3 = arith.constant 0 : index
    %c0_4 = arith.constant 0 : index
    %c0_5 = arith.constant 0 : index
    %7 = vector.load %arg7[%c0_3, %c0_4, %c0_5] : memref<1x2x256xf32, #tpu.memory_space<vmem>>, vector<1x2x256xf32>
    %8 = vector.shape_cast %7 : vector<1x2x256xf32> to vector<2x256xf32>
    %cst_6 = arith.constant 0.000000e+00 : f32
    %9 = vector.shape_cast %6 : vector<1x256xi1> to vector<1x256xi1>
    %10 = vector.broadcast %9 : vector<1x256xi1> to vector<2x256xi1>
    %11 = vector.broadcast %cst_6 : f32 to vector<2x256xf32>
    %12 = arith.select %10, %8, %11 : vector<2x256xi1>, vector<2x256xf32>
    %c0_7 = arith.constant 0 : index
    %c0_8 = arith.constant 0 : index
    %c0_9 = arith.constant 0 : index
    %13 = vector.load %arg8[%c0_7, %c0_8, %c0_9] : memref<1x2x256xf32, #tpu.memory_space<vmem>>, vector<1x2x256xf32>
    %14 = vector.shape_cast %13 : vector<1x2x256xf32> to vector<2x256xf32>
    %15 = vector.shape_cast %12 : vector<2x256xf32> to vector<1x2x256xf32>
    tpu.vector_store %arg8[%c0_7, %c0_8, %c0_9], %15 {strides = array<i32>} : memref<1x2x256xf32, #tpu.memory_space<vmem>>, vector<1x2x256xf32>,
    %c0_10 = arith.constant 0 : index
    %c0_11 = arith.constant 0 : index
    %16 = vector.load %arg12[%c0_10, %c0_11] : memref<4x1xf32, #tpu.memory_space<vmem>>, vector<4x1xf32>
    %c0_12 = arith.constant 0 : index
    %c0_13 = arith.constant 0 : index
    %c0_14 = arith.constant 0 : index
    %17 = vector.load %arg4[%c0_12, %c0_13, %c0_14] : memref<1x4x256xf32, #tpu.memory_space<vmem>>, vector<1x4x256xf32>
    %18 = vector.shape_cast %17 : vector<1x4x256xf32> to vector<4x256xf32>
    %cst_15 = arith.constant 0.000000e+00 : f32
    %19 = vector.shape_cast %6 : vector<1x256xi1> to vector<1x256xi1>
    %20 = vector.broadcast %19 : vector<1x256xi1> to vector<4x256xi1>
    %21 = vector.broadcast %cst_15 : f32 to vector<4x256xf32>
    %22 = arith.select %20, %18, %21 : vector<4x256xi1>, vector<4x256xf32>
    %cst_16 = arith.constant dense<0.000000e+00> : vector<4xf32>
    %23 = vector.multi_reduction <add>, %22, %cst_16 [1] : vector<4x256xf32> to vector<4xf32>
    %24 = vector.shape_cast %23 : vector<4xf32> to vector<4x1xf32>
    %25 = arith.addf %16, %24 : vector<4x1xf32>
    %c0_17 = arith.constant 0 : index
    %c0_18 = arith.constant 0 : index
    %26 = vector.load %arg12[%c0_17, %c0_18] : memref<4x1xf32, #tpu.memory_space<vmem>>, vector<4x1xf32>
    tpu.vector_store %arg12[%c0_17, %c0_18], %25 {strides = array<i32>} : memref<4x1xf32, #tpu.memory_space<vmem>>, vector<4x1xf32>,
    %c0_19 = arith.constant 0 : index
    %c0_20 = arith.constant 0 : index
    %27 = vector.load %arg13[%c0_19, %c0_20] : memref<3x1xf32, #tpu.memory_space<vmem>>, vector<3x1xf32>
    %c0_21 = arith.constant 0 : index
    %c0_22 = arith.constant 0 : index
    %c0_23 = arith.constant 0 : index
    %28 = vector.load %arg5[%c0_21, %c0_22, %c0_23] : memref<1x3x256xf32, #tpu.memory_space<vmem>>, vector<1x3x256xf32>
    %29 = vector.shape_cast %28 : vector<1x3x256xf32> to vector<3x256xf32>
    %cst_24 = arith.constant 0.000000e+00 : f32
    %30 = vector.shape_cast %6 : vector<1x256xi1> to vector<1x256xi1>
    %31 = vector.broadcast %30 : vector<1x256xi1> to vector<3x256xi1>
    %32 = vector.broadcast %cst_24 : f32 to vector<3x256xf32>
    %33 = arith.select %31, %29, %32 : vector<3x256xi1>, vector<3x256xf32>
    %cst_25 = arith.constant dense<0.000000e+00> : vector<3xf32>
    %34 = vector.multi_reduction <add>, %33, %cst_25 [1] : vector<3x256xf32> to vector<3xf32>
    %35 = vector.shape_cast %34 : vector<3xf32> to vector<3x1xf32>
    %36 = arith.addf %27, %35 : vector<3x1xf32>
    %c0_26 = arith.constant 0 : index
    %c0_27 = arith.constant 0 : index
    %37 = vector.load %arg13[%c0_26, %c0_27] : memref<3x1xf32, #tpu.memory_space<vmem>>, vector<3x1xf32>
    tpu.vector_store %arg13[%c0_26, %c0_27], %36 {strides = array<i32>} : memref<3x1xf32, #tpu.memory_space<vmem>>, vector<3x1xf32>,
    %c0_28 = arith.constant 0 : index
    %c0_29 = arith.constant 0 : index
    %38 = vector.load %arg14[%c0_28, %c0_29] : memref<1x1xf32, #tpu.memory_space<vmem>>, vector<1x1xf32>
    %c0_30 = arith.constant 0 : index
    %c0_31 = arith.constant 0 : index
    %c0_32 = arith.constant 0 : index
    %39 = vector.load %arg6[%c0_30, %c0_31, %c0_32] : memref<1x1x256xf32, #tpu.memory_space<vmem>>, vector<1x1x256xf32>
    %40 = vector.shape_cast %39 : vector<1x1x256xf32> to vector<1x256xf32>
    %cst_33 = arith.constant 0.000000e+00 : f32
    %41 = vector.broadcast %cst_33 : f32 to vector<1x256xf32>
    %42 = arith.select %6, %40, %41 : vector<1x256xi1>, vector<1x256xf32>
    %cst_34 = arith.constant dense<0.000000e+00> : vector<1xf32>
    %43 = vector.multi_reduction <add>, %42, %cst_34 [1] : vector<1x256xf32> to vector<1xf32>
    %44 = vector.shape_cast %43 : vector<1xf32> to vector<1x1xf32>
    %45 = arith.addf %38, %44 : vector<1x1xf32>
    %c0_35 = arith.constant 0 : index
    %c0_36 = arith.constant 0 : index
    %46 = vector.load %arg14[%c0_35, %c0_36] : memref<1x1xf32, #tpu.memory_space<vmem>>, vector<1x1xf32>
    tpu.vector_store %arg14[%c0_35, %c0_36], %45 {strides = array<i32>} : memref<1x1xf32, #tpu.memory_space<vmem>>, vector<1x1xf32>,
    %c0_37 = arith.constant 0 : index
    %c0_38 = arith.constant 0 : index
    %47 = vector.load %arg15[%c0_37, %c0_38] : memref<1x1xf32, #tpu.memory_space<vmem>>, vector<1x1xf32>
    %cst_39 = arith.constant dense<0.000000e+00> : vector<1xf32>
    %48 = vector.multi_reduction <add>, %4, %cst_39 [1] : vector<1x256xf32> to vector<1xf32>
    %49 = vector.shape_cast %48 : vector<1xf32> to vector<1x1xf32>
    %50 = arith.addf %47, %49 : vector<1x1xf32>
    %c0_40 = arith.constant 0 : index
    %c0_41 = arith.constant 0 : index
    %51 = vector.load %arg15[%c0_40, %c0_41] : memref<1x1xf32, #tpu.memory_space<vmem>>, vector<1x1xf32>
    tpu.vector_store %arg15[%c0_40, %c0_41], %50 {strides = array<i32>} : memref<1x1xf32, #tpu.memory_space<vmem>>, vector<1x1xf32>,
    %c0_i32_42 = arith.constant 0 : i32
    %52 = arith.cmpi eq, %arg1, %c0_i32_42 : i32
    %53 = arith.extui %52 : i1 to i32
    %c0_i32_43 = arith.constant 0 : i32
    %54 = arith.cmpi ne, %53, %c0_i32_43 : i32
    scf.if %54 {
      %c0_44 = arith.constant 0 : index
      %c0_45 = arith.constant 0 : index
      %55 = vector.load %arg15[%c0_44, %c0_45] : memref<1x1xf32, #tpu.memory_space<vmem>>, vector<1x1xf32>
      %cst_46 = arith.constant 1.000000e+00 : f32
      %56 = vector.broadcast %cst_46 : f32 to vector<1x1xf32>
      %57 = arith.divf %56, %55 : vector<1x1xf32>
      %c0_47 = arith.constant 0 : index
      %c0_48 = arith.constant 0 : index
      %58 = vector.load %arg12[%c0_47, %c0_48] : memref<4x1xf32, #tpu.memory_space<vmem>>, vector<4x1xf32>
      %59 = vector.broadcast %57 : vector<1x1xf32> to vector<4x1xf32>
      %60 = arith.mulf %58, %59 : vector<4x1xf32>
      %61 = arith.mulf %60, %60 : vector<4x1xf32>
      %62 = vector.shape_cast %61 : vector<4x1xf32> to vector<1x4x1xf32>
      %cst_49 = arith.constant dense<0.000000e+00> : vector<1xf32>
      %63 = vector.multi_reduction <add>, %62, %cst_49 [1, 2] : vector<1x4x1xf32> to vector<1xf32>
      %64 = vector.shape_cast %63 : vector<1xf32> to vector<1x1x1xf32>
      %65 = vector.extract %64[0, 0, 0] : f32 from vector<1x1x1xf32>
      %66 = vector.broadcast %65 : f32 to vector<1x1xf32>
      %67 = math.sqrt %66 : vector<1x1xf32>
      %cst_50 = arith.constant 9.99999996E-13 : f32
      %68 = vector.broadcast %cst_50 : f32 to vector<1x1xf32>
      %69 = arith.maximumf %67, %68 : vector<1x1xf32>
      %70 = vector.broadcast %69 : vector<1x1xf32> to vector<4x1xf32>
      %71 = arith.divf %60, %70 : vector<4x1xf32>
      %c0_51 = arith.constant 0 : index
      %c0_52 = arith.constant 0 : index
      %c0_53 = arith.constant 0 : index
      %72 = vector.load %arg9[%c0_51, %c0_52, %c0_53] : memref<1x4x1xf32, #tpu.memory_space<vmem>>, vector<1x4x1xf32>
      %73 = vector.shape_cast %72 : vector<1x4x1xf32> to vector<4x1xf32>
      %74 = vector.shape_cast %71 : vector<4x1xf32> to vector<1x4x1xf32>
      tpu.vector_store %arg9[%c0_51, %c0_52, %c0_53], %74 {strides = array<i32>} : memref<1x4x1xf32, #tpu.memory_space<vmem>>, vector<1x4x1xf32>,
      %c0_54 = arith.constant 0 : index
      %c0_55 = arith.constant 0 : index
      %75 = vector.load %arg13[%c0_54, %c0_55] : memref<3x1xf32, #tpu.memory_space<vmem>>, vector<3x1xf32>
      %76 = vector.broadcast %57 : vector<1x1xf32> to vector<3x1xf32>
      %77 = arith.mulf %75, %76 : vector<3x1xf32>
      %c0_56 = arith.constant 0 : index
      %c0_57 = arith.constant 0 : index
      %c0_58 = arith.constant 0 : index
      %78 = vector.load %arg10[%c0_56, %c0_57, %c0_58] : memref<1x3x1xf32, #tpu.memory_space<vmem>>, vector<1x3x1xf32>
      %79 = vector.shape_cast %78 : vector<1x3x1xf32> to vector<3x1xf32>
      %80 = vector.shape_cast %77 : vector<3x1xf32> to vector<1x3x1xf32>
      tpu.vector_store %arg10[%c0_56, %c0_57, %c0_58], %80 {strides = array<i32>} : memref<1x3x1xf32, #tpu.memory_space<vmem>>, vector<1x3x1xf32>,
      %c0_59 = arith.constant 0 : index
      %c0_60 = arith.constant 0 : index
      %81 = vector.load %arg14[%c0_59, %c0_60] : memref<1x1xf32, #tpu.memory_space<vmem>>, vector<1x1xf32>
      %82 = arith.mulf %81, %57 : vector<1x1xf32>
      %83 = math.exp %82 : vector<1x1xf32>
      %c0_61 = arith.constant 0 : index
      %c0_62 = arith.constant 0 : index
      %c0_63 = arith.constant 0 : index
      %84 = vector.load %arg11[%c0_61, %c0_62, %c0_63] : memref<1x1x1xf32, #tpu.memory_space<vmem>>, vector<1x1x1xf32>
      %85 = vector.shape_cast %84 : vector<1x1x1xf32> to vector<1x1xf32>
      %86 = vector.shape_cast %83 : vector<1x1xf32> to vector<1x1x1xf32>
      tpu.vector_store %arg11[%c0_61, %c0_62, %c0_63], %86 {strides = array<i32>} : memref<1x1x1xf32, #tpu.memory_space<vmem>>, vector<1x1x1xf32>,
    } else {
    }
    return
  }
  func.func @transform_0(%arg0: i32, %arg1: i32, %arg2: memref<5xi32, #tpu.memory_space<smem>>) -> (i32, i32, i32) {
    %c0_i32 = arith.constant 0 : i32
    %c0_i32_0 = arith.constant 0 : i32
    return %arg0, %c0_i32, %arg1 : i32, i32, i32
  }
  func.func @transform_1(%arg0: i32, %arg1: i32, %arg2: memref<5xi32, #tpu.memory_space<smem>>) -> (i32, i32, i32) {
    %0 = arith.index_cast %arg0 : i32 to index
    %1 = memref.load %arg2[%0] : memref<5xi32, #tpu.memory_space<smem>>
    %c0_i32 = arith.constant 0 : i32
    %c0_i32_0 = arith.constant 0 : i32
    return %1, %c0_i32, %arg1 : i32, i32, i32
  }
  func.func @transform_2(%arg0: i32, %arg1: i32, %arg2: memref<5xi32, #tpu.memory_space<smem>>) -> (i32, i32, i32) {
    %0 = arith.index_cast %arg0 : i32 to index
    %1 = memref.load %arg2[%0] : memref<5xi32, #tpu.memory_space<smem>>
    %c0_i32 = arith.constant 0 : i32
    %c0_i32_0 = arith.constant 0 : i32
    return %1, %c0_i32, %arg1 : i32, i32, i32
  }
  func.func @transform_3(%arg0: i32, %arg1: i32, %arg2: memref<5xi32, #tpu.memory_space<smem>>) -> (i32, i32, i32) {
    %0 = arith.index_cast %arg0 : i32 to index
    %1 = memref.load %arg2[%0] : memref<5xi32, #tpu.memory_space<smem>>
    %c0_i32 = arith.constant 0 : i32
    %c0_i32_0 = arith.constant 0 : i32
    return %1, %c0_i32, %arg1 : i32, i32, i32
  }
  func.func @transform_4(%arg0: i32, %arg1: i32, %arg2: memref<5xi32, #tpu.memory_space<smem>>) -> (i32, i32, i32) {
    %0 = arith.index_cast %arg0 : i32 to index
    %1 = memref.load %arg2[%0] : memref<5xi32, #tpu.memory_space<smem>>
    %c0_i32 = arith.constant 0 : i32
    %c0_i32_0 = arith.constant 0 : i32
    return %1, %c0_i32, %arg1 : i32, i32, i32
  }
  func.func @transform_5(%arg0: i32, %arg1: i32, %arg2: memref<5xi32, #tpu.memory_space<smem>>) -> (i32, i32, i32) {
    %c0_i32 = arith.constant 0 : i32
    %c0_i32_0 = arith.constant 0 : i32
    return %arg0, %c0_i32, %arg1 : i32, i32, i32
  }
  func.func @transform_6(%arg0: i32, %arg1: i32, %arg2: memref<5xi32, #tpu.memory_space<smem>>) -> (i32, i32, i32) {
    %c0_i32 = arith.constant 0 : i32
    %c0_i32_0 = arith.constant 0 : i32
    %c0_i32_1 = arith.constant 0 : i32
    return %arg0, %c0_i32, %c0_i32_0 : i32, i32, i32
  }
  func.func @transform_7(%arg0: i32, %arg1: i32, %arg2: memref<5xi32, #tpu.memory_space<smem>>) -> (i32, i32, i32) {
    %c0_i32 = arith.constant 0 : i32
    %c0_i32_0 = arith.constant 0 : i32
    %c0_i32_1 = arith.constant 0 : i32
    return %arg0, %c0_i32, %c0_i32_0 : i32, i32, i32
  }
  func.func @transform_8(%arg0: i32, %arg1: i32, %arg2: memref<5xi32, #tpu.memory_space<smem>>) -> (i32, i32, i32) {
    %c0_i32 = arith.constant 0 : i32
    %c0_i32_0 = arith.constant 0 : i32
    %c0_i32_1 = arith.constant 0 : i32
    return %arg0, %c0_i32, %c0_i32_0 : i32, i32, i32
  }
}

</mosaic_0001>

<bundles_post_ra>
// kernel: tpu_custom_call.1
= control target key start
LH: loop header
LB: loop body
LE: loop exit
PB: predicated region body
PF: predicated region fallthrough
CT: control target
= control target key end

     0   :  { %s1393_s0 = inlined_call_operand.vmem [shape: s32[5], index: 0, kind: input, shape index: {}]   ;;  %s1394_s1 = inlined_call_operand.vmem [shape: f32[5,1,256], index: 1, kind: input, shape index: {}]   ;;  %s1395_s2 = inlined_call_operand.vmem [shape: f32[2,4,256], index: 2, kind: input, shape index: {}]   ;;  %s1396_s3 = inlined_call_operand.vmem [shape: f32[2,3,256], index: 3, kind: input, shape index: {}]   ;;  %s1397_s4 = inlined_call_operand.vmem [shape: f32[2,1,256], index: 4, kind: input, shape index: {}]   ;;  %s1398_s5 = inlined_call_operand.vmem [shape: f32[2,2,256], index: 5, kind: input, shape index: {}]   ;;  %s1399_s6 = inlined_call_operand.hbm [shape: f32[5,2,256], index: 6, kind: output, shape index: {0}]   ;;  %s1400_s7 = inlined_call_operand.vmem [shape: f32[5,4,1], index: 7, kind: output, shape index: {1}]   ;;  %s1401_s8 = inlined_call_operand.vmem [shape: f32[5,3,1], index: 8, kind: output, shape index: {2}]   ;;  %s1402_s9 = inlined_call_operand.vmem [shape: f32[5,1,1], index: 9, kind: output, shape index: {3}]  }
   0x1   :  { %1404 = sst [smem:[#allocation12_spill]] %s1394_s1  ;;  %s15_s11 = sshll.u32 %s1393_s0, 4  ;;  %s16_s11 = int_to_ptr.vmem [resolvable:$true] %s15_s11 }
   0x2   :  { %1405 = sst [smem:[#allocation13_spill]] %s1395_s2  ;;  %s1049_s12 = scalar_lea.vmem %s16_s11, 16 }
   0x3   :  { %p1050_p0 = scmp.ne.s32.totalorder %s16_s11, %s1049_s12  ;;  %p1054_p1 = scmp.lt.s32.totalorder %s16_s11, %s16_s11 }
   0x4   :  { %p1055_p2 = scmp.lt.s32.totalorder %s1049_s12, %s1049_s12 }
   0x6   :  { %p1056_p3 = por %p1055_p2, %p1054_p1 }
   0x8   :  { %p1057_p4 = pnand %p1056_p3, %p1050_p0 }
   0xa   :  { %1060 = shalt.err (!%p1057_p4)  }
   0xb   :  { %s1143_s13 = smov [#allocation7]  }
   0xc   :  { %18 = dma.vmem_to_smem %s16_s11, 16, %s1143_s13, [#allocation6] }
   0xd   :  { %1113 = dma.done.wait [#allocation6], 16 }
   0xe   :  { %1114 = vsyncadd [#allocation6], 4294967280 }
   0xf   :  { %20 = sfence }
  0x10   :  { %21 = vsyncpa [#allocation9], 0 }
  0x11   :  { %23 = vsyncpa [#allocation9 + $0x1], 0  ;;  %s1200_s14 = smov 0   ;;  %s1202_s15 = smov 0  }
  0x12   :  { %s1204_s0 = smov 0   ;;  %s1206_s16 = smov 0  }
  0x13   :  { %s1208_s17 = smov 0   ;;  %s1210_s18 = smov 0  }
  0x14 LB: > { %s952_s19 = sadd.s32 4294967295, %s1141_s18   ;;  %s953_s20 = sadd.s32 4294967294, %s1141_s18   ;;  %s1141_s18 = sphi %s1210_s18, %s29_s18   ;;  %s1137_s17 = sphi %s1208_s17, %s1419_s17   ;;  %s1133_s16 = sphi %s1206_s16, %s1418_s16   ;;  %s1129_s0 = sphi %s1204_s0, %s1417_s0   ;;  %s1125_s15 = sphi %s1202_s15, %s1416_s15   ;;  %s1121_s14 = sphi %s1200_s14, %s1415_s14  }
  0x15   : > { %s41_s21 = sadd.s32 1, %s1137_s17  ;;  %s198_s22 = sadd.s32 1, %s1129_s0 }
  0x16   : > { %p43_p5 = scmp.ge.s32.totalorder %s41_s21, 5  ;;  %p208_p6 = scmp.ne.s32.totalorder %s1129_s0, %s1125_s15 }
  0x17   : > { %p209_p7 = scmp.eq.s32.totalorder %s952_s19, 4  ;;  %p214_p8 = scmp.ne.s32.totalorder %s1125_s15, %s1121_s14 }
  0x18   : > { %s1421_s21 = smov (%p43_p5, %s41_s21), 0  ;;  %p215_p10 = scmp.eq.s32.totalorder %s953_s20, 4 }
  0x19   : > { %p1240_p9 = por %p209_p7, %p208_p6  ;;  %s193_s24 = ssub.s32 %s1137_s17, %s1421_s21 }
  0x1a   : > { %p956_p11 = scmp.ge.s32.totalorder %s1141_s18, 1  ;;  %p196_p12 = scmp.eq.s32.totalorder %s193_s24, 0 }
  0x1b   : > { %p1247_p13 = por %p215_p10, %p214_p8  ;;  %p382_p0 = scmp.lt.s32.totalorder %s1141_s18, 6 }
  0x1c   : > { %s1253_s26 = scalar_select %p196_p12, %s1129_s0, %s198_s22  }
  0x1d   : > { %p383_p1 = pnand %p956_p11, %p382_p0 }
  0x1e   : > { %p470_p2 = scmp.lt.s32.totalorder (!%p383_p1), %s1133_s16, 4  ;;  %v552_v0 = vlaneseq (!%p383_p1)  ;;  %s478_s27 = sld [smem:[#allocation7 + %s1133_s16]] (!%p383_p1)  ;;  %vm545_vm0 = vcmask (!%p383_p1), 0   ;;  %v1144_v2 = vmov (!%p383_p1), 0.0   ;;  %vm633_vm1 = vcmask (!%p383_p1), 1040384  }
  0x1f   : > { %386 = sbr.rel (%p383_p1) target bundleno = 454 (0x1c6), region = 40  ;;  %s490_s28 = sld [smem:[#allocation7 + %s1133_s16]] (!%p383_p1)  ;;  %547 = vst.msk [vmem:[#allocation5] sm:$0x1] (!%p383_p1), %vm545_vm0, %v1144_v2  ;;  %546 = vst.msk [vmem:[#allocation4] sm:$0x1] (!%p383_p1), %vm545_vm0, %v1144_v2 }
  0x20   : > { %v553_v1 = vshrl.u32 (!%p383_p1), %v552_v0, 7  ;;  %s1408_s1 = sld [smem:[#allocation12_spill]] (!%p383_p1)  ;;  %v1145_v8 = vmov (!%p383_p1), 0   ;;  %s1409_s2 = sld [smem:[#allocation13_spill]] (!%p383_p1)  ;;  %vm594_vm4 = vcmask (!%p383_p1), 1043456   ;;  %vm610_vm6 = vcmask (!%p383_p1), 1042432  }
  0x21   : > { %vm541_vm7 = vcmask (!%p383_p1), 3072   ;;  %vm543_vm8 = vcmask (!%p383_p1), 2048   ;;  %s513_s10 = sld [smem:[#allocation7 + %s1133_s16]] (!%p383_p1) }
  0x22   : > { %v1264_v3 = vsub.s32 (!%p383_p1), 0, %v553_v1  ;;  %v558_v4 = vsub.s32 (!%p383_p1), 1, %v553_v1  ;;  %542 = vst.msk [vmem:[#allocation2] sm:$0xf] (!%p383_p1), %vm541_vm7, %v1144_v2 }
  0x23   : > { %544 = vst.msk [vmem:[#allocation3] sm:$0x7] (!%p383_p1), %vm543_vm8, %v1144_v2 }
  0x24   : > { %p480_p3 = scmp.lt.s32.totalorder (!%p383_p1), %s478_s27, 1 }
  0x25   : > { %p492_p4 = scmp.lt.s32.totalorder (!%p383_p1), %s490_s28, 1 }
  0x26   : > { %s1259_s29 = scalar_select %p470_p2, %s1133_s16, 4  ;;  %v642_v38 = vld [vmem:[#allocation5] sm:$0x1] }
  0x27   : > { %s1423_s27 = smov (!%p480_p3, %s478_s27), 1  ;;  %s1425_s28 = smov (!%p492_p4, %s490_s28), 1 }
  0x28   : > { %s958_s30 = sshll.u32 %s1259_s29, 1  ;;  %s975_s13 = sshll.u32 %s1423_s27, 3 }
  0x29   : > { %s476_s12 = scalar_lea.vmem %s1408_s1, %s958_s30  ;;  %s487_s22 = scalar_lea.vmem %s1409_s2, %s975_s13  ;;  %v587_v41 = vld [vmem:[#allocation2] sm:$0xf] }
  0x2a   : > { %v548_v5 = vld [vmem:[%s476_s12] sm:$0x3]  ;;  %s976_s24 = sshll.u32 %s1425_s28, 3  ;;  %s502_s28 = sld [smem:[#allocation7 + %s1133_s16]]  ;;  %v603_v44 = vld [vmem:[#allocation3] sm:$0x7] }
  0x2b   : > { %v647_v6 = vrot.slane %v548_v5, %v1264_v3  ;;  %v651_v7 = vrot.slane %v548_v5, %v558_v4  ;;  %vm549_vm2 = vcmp.ne.f32.partialorder %v548_v5, 0.0  ;;  %v588_v17 = vld [vmem:[%s487_s22] sm:$0xff]  ;;  %s499_s27 = scalar_lea.vmem %s1396_s3, %s976_s24  ;;  %s1403_s20 = sshll.u32 %s1259_s29, 2 }
  0x2c   : > { %v551_v9 = vsel %vm549_vm2, 1, %v1145_v8  ;;  %v590_v18 = vcombine.high %v588_v17, %v588_v17  ;;  %v604_v20 = vld [vmem:[%s499_s27] sm:$0x77]  ;;  %s533_s30 = scalar_lea.vmem %s1401_s8, %s1403_s20  ;;  %p515_p6 = scmp.lt.s32.totalorder %s513_s10, 1 }
  0x2d   : > { %v654_v10 = vsel %vm633_vm1, %v647_v6, 0.0  ;;  %v655_v11 = vsel %vm633_vm1, %v651_v7, 0.0  ;;  %v555_v12 = vrot.slane %v551_v9, %v1264_v3  ;;  %v559_v13 = vrot.slane %v551_v9, %v558_v4  ;;  %s449_s13 = sand.u32 1, %s1125_s15   ;;  %s978_s22 = sshll.u32 %s1133_s16, 6 }
  0x2e   : > { %v656_v14 = vadd.f32 %v655_v11, %v654_v10  ;;  %v606_v22 = vcombine.high %v604_v20, %v604_v20  ;;  %s1429_s10 = smov (!%p515_p6, %s513_s10), 1 }
  0x2f   : > { %vm1277_vm3 = vcmp.eq.s32.totalorder %v555_v12, 1  ;;  %vm1281_vm5 = vcmp.eq.s32.totalorder %v559_v13, 1  ;;  %s977_s27 = sshll.u32 %s1429_s10, 2 }
  0x30   : > { %657 = vadd.xlane.f32.xlu0 %v656_v14  ;;  %v592_v19 = vsel %vm1277_vm3, %v588_v17, 0.0  ;;  %v608_v23 = vsel %vm1277_vm3, %v604_v20, 0.0  ;;  %v593_v24 = vsel %vm1281_vm5, %v590_v18, 0.0  ;;  %v609_v26 = vsel %vm1281_vm5, %v606_v22, 0.0  ;;  %p504_p5 = scmp.lt.s32.totalorder %s502_s28, 1  ;;  %s522_s12 = scalar_lea.vmem %s1398_s5, %s977_s27 }
  0x31   : > { %v595_v21 = vsel %vm594_vm4, %v592_v19, 0.0  ;;  %v596_v25 = vsel %vm594_vm4, %v593_v24, 0.0  ;;  %v611_v27 = vsel %vm610_vm6, %v608_v23, 0.0  ;;  %v612_v29 = vsel %vm610_vm6, %v609_v26, 0.0  ;;  %s1338_s27 = scalar_lea.hbm %s1399_s6, %s978_s22 }
  0x32   : > { %v597_v28 = vadd.f32 %v596_v25, %v595_v21  ;;  %v613_v30 = vadd.f32 %v612_v29, %v611_v27  ;;  %s1427_s28 = smov (!%p504_p5, %s502_s28), 1  ;;  %v968_v56 = vld.sshfl [vmem:[%s522_s12] sm:$0x33 pattern:$0x76325410]  ;;  %s1146_s12 = smov [#allocation8]  }
  0x33   : > { %s963_s11 = sshll.u32 %s1427_s28, 1  ;;  %v570_v57 = vcombine.high %v968_v56, %v968_v56  ;;  %v573_v58 = vsel %vm1277_vm3, %v968_v56, 0.0  ;;  %s707_s28 = scalar_lea.sflag [#allocation9], %s449_s13 }
  0x34   : > { %598 = vadd.xlane.f32.xlu0 %v597_v28  ;;  %s510_s19 = scalar_lea.vmem %s1397_s4, %s963_s11  ;;  %s1065_s1 = sshll.u32 %s1146_s12, 4  ;;  %s1066_s1 = int_to_ptr.vmem [resolvable:$false] %s1065_s1 }
  0x35   : > { %v620_v31 = vld [vmem:[%s510_s19] sm:$0x3]  ;;  %s957_s19 = sshll.u32 %s449_s13, 2  ;;  %v574_v59 = vsel %vm1281_vm5, %v570_v57, 0.0  ;;  %s1067_s2 = scalar_lea.vmem %s1066_s1, 128 }
  0x36   : > { %v621_v32 = vsel %vm549_vm2, %v620_v31, 0.0  ;;  %v577_v60 = vcombine.low %v573_v58, %v574_v59  ;;  %s451_s24 = scalar_lea.vmem [#allocation8], %s957_s19 }
  0x37   : > { %v626_v33 = vrot.slane %v621_v32, %v1264_v3  ;;  %v630_v34 = vrot.slane %v621_v32, %v558_v4 }
  0x38   : > { %614 = vadd.xlane.f32.xlu0 %v613_v30  ;;  %969 = vst.sshfl [vmem:[%s451_s24] sm:$0x33 pattern:$0x76325410] %v577_v60 }
  0x39   : > { %v634_v35 = vsel %vm633_vm1, %v626_v33, 0.0  ;;  %v635_v36 = vsel %vm633_vm1, %v630_v34, 0.0 }
  0x3a   : > { %v636_v37 = vadd.f32 %v635_v36, %v634_v35 }
  0xbd   : > { %v658_v39 = vpop.xlane.xlu0 %657 }
  0xbe   : > { %v659_v40 = vadd.f32 %v658_v39, %v642_v38 }
  0xc0   : > { %660 = vst.msk [vmem:[#allocation5] sm:$0x1] %vm545_vm0, %v659_v40 }
  0xc1   : > { %v599_v42 = vpop.xlane.xlu0 %598 }
  0xc2   : > { %v600_v43 = vadd.f32 %v599_v42, %v587_v41 }
  0xc4   : > { %602 = vst.msk [vmem:[#allocation2] sm:$0xf] %vm541_vm7, %v600_v43 }
  0xc5   : > { %v615_v46 = vpop.xlane.xlu0 %614 }
  0xc6   : > { %v616_v47 = vadd.f32 %v615_v46, %v603_v44 }
  0xc7   : > { %v664_v45 = vld [vmem:[#allocation5] sm:$0x1] }
  0xc8   : > { %1041 = vrcp.f32 %v664_v45  ;;  %618 = vst.msk [vmem:[#allocation3] sm:$0x7] %vm543_vm8, %v616_v47 }
  0xcb   : > { %v667_v49 = vld [vmem:[#allocation2] sm:$0xf] }
  0xcf   : > { %v698_v50 = vld [vmem:[#allocation3] sm:$0x7] }
  0xd2   : > { %v1310_v48 = vpop.eup %1041 }
  0xd3   : > { %v672_v51 = vrot.slane %v1310_v48, %v1264_v3 }
  0xd5   : > { %v1319_v52 = vmul.f32 %v672_v51, %v667_v49  ;;  %v699_v53 = vmul.f32 %v698_v50, %v672_v51 }
  0xd7   : > { %v675_v54 = vmul.f32 %v1319_v52, %v1319_v52  ;;  %700 = vst.msk [vmem:[%s533_s30] sm:$0x7] %vm543_vm8, %v699_v53  ;;  %s734_s30 = sshll.u32 %s451_s24, 4  ;;  %s735_s30 = int_to_ptr.vmem [resolvable:$true] %s734_s30 }
  0xd8   : > { %s1061_s11 = scalar_lea.vmem %s735_s30, 64  ;;  %p1068_p11 = scmp.lt.s32.totalorder %s735_s30, %s1066_s1 }
  0xd9   : > { %v676_v55 = vsel %vm541_vm7, %v675_v54, 0.0  ;;  %p1062_p7 = scmp.ne.s32.totalorder %s735_s30, %s1061_s11  ;;  %p1069_p12 = scmp.lt.s32.totalorder %s1067_s2, %s1061_s11 }
  0xda   : > { %677 = vadd.xlane.f32.xlu1 %v676_v55 }
  0xdb   : > { %p1063_p8 = pnand %p1062_p7, %p1240_p9  ;;  %p1070_p0 = por %p1069_p12, %p1068_p11 }
  0xdd   : > { %p1064_p10 = pneg %p1063_p8 }
  0xde   : > { %637 = vadd.xlane.f32.xlu1 %v636_v37 }
  0xdf   : > { %p1071_p1 = pnand %p1070_p0, %p1064_p10 }
  0xe1   : > { %1074 = shalt.err (!%p1071_p1)
}
  0xe2   : > { %s1075_s16 = scalar_lea.hbm %s1338_s27, 64  ;;  %s1079_s19 = scalar_lea.hbm %s1399_s6, 320 }
  0xe3   : > { %p1076_p2 = scmp.ne.s32.totalorder %s1338_s27, %s1075_s16  ;;  %p1080_p5 = scmp.lt.u32.totalorder %s1338_s27, %s1399_s6 }
  0xe4   : > { %p1081_p6 = scmp.lt.u32.totalorder %s1079_s19, %s1075_s16  ;;  %p1083_p8 = scmp.lt.u32.totalorder %s1075_s16, %s1338_s27 }
  0xe5   : > { %p1077_p3 = pnand %p1076_p2, %p1240_p9 }
  0xe6   : > { %p1082_p7 = por %p1081_p6, %p1080_p5 }
  0xe7   : > { %p1078_p4 = pneg %p1077_p3 }
  0xe8   : > { %p1084_p10 = por %p1083_p8, %p1082_p7 }
  0xea   : > { %p1085_p11 = pnand %p1084_p10, %p1078_p4 }
  0xec   : > { %1088 = shalt.err (!%p1085_p11)
}
  0xed   : > { %981 = dma.vmem_to_hbm [thread:$0]  (%p1240_p9), %s735_s30, 64, %s1338_s27, %s707_s28   ;;  %v619_v63 = vld [vmem:[#allocation4] sm:$0x1] }
  0xee   : > { %s536_s24 = scalar_lea.vmem %s1402_s9, %s1259_s29  ;;  %s1414_s10 = sshll.u32 %s1259_s29, 2 }
  0xef   : > { %s529_s11 = scalar_lea.vmem %s1400_s7, %s1414_s10 }
 0x167   : > { %v678_v61 = vpop.xlane.xlu1 %677 }
 0x168   : > { %v679_v62 = vrot.slane %v678_v61, 4 }
 0x16a   : > { %v680_v0 = vadd.f32 %v679_v62, %v678_v61 }
 0x16b   : > { %v638_v1 = vpop.xlane.xlu1 %637 }
 0x16c   : > { %v681_v2 = vrot.slane %v680_v0, 2  ;;  %v639_v3 = vadd.f32 %v638_v1, %v619_v63 }
 0x16e   : > { %641 = vst.msk [vmem:[#allocation4] sm:$0x1] %vm545_vm0, %v639_v3  ;;  %v682_v4 = vadd.f32 %v681_v2, %v680_v0 }
 0x170   : > { %v683_v5 = vrot.slane %v682_v4, 1 }
 0x172   : > { %v684_v6 = vadd.f32 %v683_v5, %v682_v4 }
 0x174   : > { %979 = vpush %v684_v6 }
 0x175   : > { %v701_v7 = vld [vmem:[#allocation4] sm:$0x1] }
 0x176   : > { %v702_v8 = vmul.f32 %v1310_v48, %v701_v7 }
 0x178   : > { %v703_v9 = vmul.f32 1.442695, %v702_v8 }
 0x17a   : > { %1043 = vpow2.f32 %v703_v9 }
 0x184   : > { %v1044_v10 = vpop.eup %1043 }
 0x185   : > { %705 = vst.msk [vmem:[%s536_s24] sm:$0x1] %vm545_vm0, %v1044_v10 }
 0x1a5   : > { %s980_s30 = spop %979 }
 0x1a6   : > { %v686_v11 = vstv %s980_s30 }
 0x1a7   : > { %1045 = vrsqrt.f32 %v686_v11  ;;  %vm689_vm9 = vcmp.eq.f32.partialorder %v686_v11, inf  ;;  %v692_v14 = vand.u32 2147483648, %v686_v11  ;;  %vm691_vm10 = vcmp.eq.f32.partialorder %v686_v11, 0.0 }
 0x1b1   : > { %v1046_v12 = vpop.eup %1045 }
 0x1b2   : > { %v688_v13 = vmul.f32 %v1046_v12, %v686_v11 }
 0x1b4   : > { %v690_v15 = vsel %vm689_vm9, %v686_v11, %v688_v13 }
 0x1b5   : > { %v693_v16 = vsel %vm691_vm10, %v692_v14, %v690_v15 }
 0x1b6   : > { %v694_v17 = vmax.f32 %v693_v16, 1e-12 }
 0x1b8   : > { %1047 = vrcp.f32 %v694_v17 }
 0x1c2   : > { %v1048_v18 = vpop.eup %1047 }
 0x1c3   : > { %v696_v19 = vmul.f32 %v1048_v18, %v1319_v52 }
 0x1c5   : > { %697 = vst.msk [vmem:[%s529_s11] sm:$0xf] %vm541_vm7, %v696_v19 }
 0x1c6 PF: > { %p987_p9 = scmp.ge.s32.totalorder %s1141_s18, 2  ;;  %s755_s12 = sand.u32 1, %s1121_s14  }
 0x1c7   : > { %s756_s16 = scalar_lea.sflag [#allocation9], %s755_s12 }
 0x1c8   : > { %p984_p12 = pnand %p987_p9, %p1247_p13 }
 0x1ca   : > { %1116 = dma.done.wait (!%p984_p12), %s756_s16, 64  }
 0x1cb   : > { %1118 = vsyncadd (!%p984_p12), %s756_s16, 4294967232  ;;  %s29_s18 = sadd.s32 1, %s1141_s18   ;;  %s1415_s14 = smov %s1125_s15 }
 0x1cc   : > { %p26_p0 = scmp.ge.s32.totalorder %s29_s18, 7   ;;  %s1416_s15 = smov %s1129_s0 }
 0x1cd   : > { %s1417_s0 = smov %s1253_s26  ;;  %s1418_s16 = smov %s1137_s17 }
 0x1ce   : > { %s1419_s17 = smov %s1421_s21  ;;  %28 = sbr.rel (!%p26_p0) target bundleno = 20 (0x14), region = 131 }
 0x1d5   :  { %781 = vsyncpa [#allocation9], 1 }
 0x1d6   :  { %783 = vsyncpa [#allocation9 + $0x1], 1 }

</bundles_post_ra>
